<compile_context>
chip_gen: v7x
topology: tpu7x:2x2x1
jax: 0.10.0
libtpu: 0.0.40
codegen_flags: <defaults>
</compile_context>

<pallas_src>
import functools
import math

import jax
import jax.numpy as jnp
from jax.experimental import pallas as pl
from jax.experimental.pallas import tpu as pltpu

# ---- small synthetic BERT config -------------------------------------------
VOCAB = 30          # prot_bert vocab is tiny (amino-acid tokens)
TYPE_VOCAB = 2
MAX_POS = 64
HIDDEN = 32
N_HEADS = 2
HEAD_DIM = HIDDEN // N_HEADS
INTERMEDIATE = 64
N_LAYERS = 2
N_CLASSES = 5
CLS_PAD = 128       # lane-dense padded classifier width (sliced to N_CLASSES outside)
LN_EPS = 1e-12      # HF BERT layer_norm_eps


# ---------------------------------------------------------------------------
# In-kernel helper
# ---------------------------------------------------------------------------
def _ln(x, gamma, beta):
    mean = jnp.mean(x, axis=-1, keepdims=True)
    cent = x - mean
    var = jnp.mean(cent * cent, axis=-1, keepdims=True)
    return cent * jax.lax.rsqrt(var + LN_EPS) * gamma + beta


# ---------------------------------------------------------------------------
# Kernel 1: fused embedding-LN + all encoder layers
#   grid = (batch, layer); activation lives in a VMEM scratch across the layer
#   axis; the output block (same index over L) is written only at the last
#   layer.  Heads are kept on the leading axis of 3-D tensors so all attention
#   math is batched matmuls (no lane slicing / concat).
# ---------------------------------------------------------------------------
def _encoder_stack_kernel(xemb_ref, mask_ref, embln_ref,
                          wqkv_ref, bqkv_ref, wo_ref, w1_ref, w2_ref, vecs_ref,
                          o_ref, x_vmem,
                          *, n_heads, n_layers, hidden, scale):
    l = pl.program_id(1)

    # Layer 0: apply the (fused) embedding LayerNorm and load the activation
    # into the resident VMEM scratch for this batch element.
    @pl.when(l == 0)
    def _():
        emb_g = embln_ref[0:1, :]
        emb_b = embln_ref[1:2, :]
        x_vmem[...] = _ln(xemb_ref[...], emb_g, emb_b)

    x = x_vmem[...]                                   # (S, H) f32, resident
    S = x.shape[0]

    # --- unpack the packed per-layer small vectors (one DMA) ----------------
    vecs = vecs_ref[0]                                # (8, I)
    o_b   = vecs[0:1, :hidden]
    ln1_g = vecs[1:2, :hidden]
    ln1_b = vecs[2:3, :hidden]
    f1_b  = vecs[3:4, :]
    f2_b  = vecs[4:5, :hidden]
    ln2_g = vecs[5:6, :hidden]
    ln2_b = vecs[6:7, :hidden]

    wqkv = wqkv_ref[0]                                # (3nh, H, hd)
    bqkv = bqkv_ref[0]                                # (3nh, 1, hd)

    # --- fused QKV projection: heads/groups on the leading (batch) axis -----
    xg = jnp.broadcast_to(x[None, :, :], (3 * n_heads, S, hidden))
    qkv = jnp.einsum('gsh,ghd->gsd', xg, wqkv,
                     preferred_element_type=jnp.float32) + bqkv   # (3nh, S, hd)

    q = qkv[:n_heads] * scale                         # fold 1/sqrt(d) into q
    k = qkv[n_heads:2 * n_heads]
    v = qkv[2 * n_heads:]

    # --- attention (batched over heads) -------------------------------------
    s = jnp.einsum('hqd,hkd->hqk', q, k, preferred_element_type=jnp.float32)
    s = s + mask_ref[0]                               # additive (1, S) key mask
    m = jnp.max(s, axis=-1, keepdims=True)
    p = jnp.exp(s - m)
    denom = jnp.sum(p, axis=-1, keepdims=True)
    p = p * pl.reciprocal(denom, approx=True)         # EUP, not VALU divide
    ctx = jnp.einsum('hqk,hkd->hqd', p, v, preferred_element_type=jnp.float32)

    # Output projection: per-head matmul + sum over heads == concat(ctx) @ Wo
    attn = jnp.einsum('hsd,hdo->hso', ctx, wo_ref[0],
                      preferred_element_type=jnp.float32)
    attn = jnp.sum(attn, axis=0) + o_b                # (S, H)

    x1 = _ln(attn + x, ln1_g, ln1_b)

    # --- feed-forward --------------------------------------------------------
    ff = jnp.dot(x1, w1_ref[0], preferred_element_type=jnp.float32) + f1_b
    # TODO(synk): HF BERT "gelu" is erf-based; tanh approximation used here
    # (differences are < 1e-3 and irrelevant for synthetic weights).
    ff = jax.nn.gelu(ff, approximate=True)
    ff = jnp.dot(ff, w2_ref[0], preferred_element_type=jnp.float32) + f2_b
    xout = _ln(ff + x1, ln2_g, ln2_b)

    x_vmem[...] = xout                                # carry to next layer

    @pl.when(l == n_layers - 1)
    def _():
        o_ref[...] = xout.astype(o_ref.dtype)


def encoder_stack(x_emb, mask_bias, p, batch, seq):
    H, I, nh, hd, L = HIDDEN, INTERMEDIATE, N_HEADS, HEAD_DIM, N_LAYERS
    kernel = functools.partial(_encoder_stack_kernel,
                               n_heads=nh, n_layers=L, hidden=H,
                               scale=1.0 / math.sqrt(hd))
    return pl.pallas_call(
        kernel,
        out_shape=jax.ShapeDtypeStruct((batch * seq, H), x_emb.dtype),
        grid=(batch, L),
        in_specs=[
            pl.BlockSpec((seq, H), lambda b, l: (b, 0)),          # embeddings of batch b
            pl.BlockSpec((1, 1, seq), lambda b, l: (b, 0, 0)),    # additive key mask
            pl.BlockSpec((2, H), lambda b, l: (0, 0)),            # embedding LN gamma/beta
            pl.BlockSpec((1, 3 * nh, H, hd), lambda b, l: (l, 0, 0, 0)),  # Wqkv (per head)
            pl.BlockSpec((1, 3 * nh, 1, hd), lambda b, l: (l, 0, 0, 0)),  # bqkv
            pl.BlockSpec((1, nh, hd, H), lambda b, l: (l, 0, 0, 0)),      # Wo (per head)
            pl.BlockSpec((1, H, I), lambda b, l: (l, 0, 0)),              # FFN W1
            pl.BlockSpec((1, I, H), lambda b, l: (l, 0, 0)),              # FFN W2
            pl.BlockSpec((1, 8, I), lambda b, l: (l, 0, 0)),              # packed small vectors
        ],
        out_specs=pl.BlockSpec((seq, H), lambda b, l: (b, 0)),    # resident across L
        scratch_shapes=[pltpu.VMEM((seq, H), jnp.float32)],       # carried activation
        compiler_params=pltpu.CompilerParams(
            dimension_semantics=("parallel", "arbitrary")),
        # TODO(synk): at real prot_bert dims (H=1024, I=4096, long seq) cast
        # weights to bf16, add a K/N-tiled reduction axis (256-multiples),
        # use pipeline_mode=pl.Buffered(1) on constant-index weight specs and
        # raise vmem_limit_bytes — required to fit v7x's 64 MiB VMEM and feed
        # the 256x256 MXU; on v5e/v6e only the bf16 cast / scoped-VMEM raise
        # is needed.
    )(x_emb, mask_bias, p["emb_ln"], p["wqkv"], p["bqkv"], p["wo"],
      p["w1"], p["w2"], p["vecs"])


# ---------------------------------------------------------------------------
# Kernel 2: fused pooler (tanh) + dropout(eval, identity) + classifier head
#   Classifier weight/bias are pre-padded to 128 output lanes so the store is
#   lane-dense; the wrapper slices back to N_CLASSES.
# ---------------------------------------------------------------------------
def _head_kernel(cls_ref, pw_ref, pb_ref, cw_ref, cb_ref, o_ref):
    pooled = jnp.dot(cls_ref[...], pw_ref[...], preferred_element_type=jnp.float32)
    pooled = jnp.tanh(pooled + pb_ref[...])
    # TODO(synk): nn.Dropout(p=0.3) before the head is identity in eval mode.
    logits = jnp.dot(pooled, cw_ref[...], preferred_element_type=jnp.float32)
    o_ref[...] = (logits + cb_ref[...]).astype(o_ref.dtype)


def pooler_classifier(cls, pool_w, pool_b, cls_w_pad, cls_b_pad):
    B, H = cls.shape
    NPAD = cls_w_pad.shape[1]
    const = lambda i: (0, 0)
    return pl.pallas_call(
        _head_kernel,
        out_shape=jax.ShapeDtypeStruct((B, NPAD), cls.dtype),
        grid=(1,),
        in_specs=[
            pl.BlockSpec((B, H), const),
            pl.BlockSpec((H, H), const),
            pl.BlockSpec((1, H), const),
            pl.BlockSpec((H, NPAD), const),
            pl.BlockSpec((1, NPAD), const),
        ],
        out_specs=pl.BlockSpec((B, NPAD), const),
    )(cls, pool_w, pool_b.reshape(1, H), cls_w_pad, cls_b_pad.reshape(1, NPAD))


# ---------------------------------------------------------------------------
# Parameters: deterministic synthetic init in natural (HF-like) layout,
# then packed into the stacked/per-head kernel layout.
# ---------------------------------------------------------------------------
def init_params(key):
    state = {"key": key}

    def nkey():
        state["key"], sub = jax.random.split(state["key"])
        return sub

    def dense(fan_in, fan_out):
        w = 0.02 * jax.random.normal(nkey(), (fan_in, fan_out), jnp.float32)
        b = jnp.zeros((fan_out,), jnp.float32)
        return (w, b)

    params = {
        "word_emb": 0.02 * jax.random.normal(nkey(), (VOCAB, HIDDEN), jnp.float32),
        "pos_emb": 0.02 * jax.random.normal(nkey(), (MAX_POS, HIDDEN), jnp.float32),
        "type_emb": 0.02 * jax.random.normal(nkey(), (TYPE_VOCAB, HIDDEN), jnp.float32),
        "emb_ln": (jnp.ones((HIDDEN,), jnp.float32), jnp.zeros((HIDDEN,), jnp.float32)),
        "layers": [],
        "pooler": dense(HIDDEN, HIDDEN),
        "classifier": dense(HIDDEN, N_CLASSES),   # nn.Linear(hidden_size, n_classes)
    }
    for _ in range(N_LAYERS):
        params["layers"].append({
            "q": dense(HIDDEN, HIDDEN),
            "k": dense(HIDDEN, HIDDEN),
            "v": dense(HIDDEN, HIDDEN),
            "o": dense(HIDDEN, HIDDEN),
            "ln1": (jnp.ones((HIDDEN,), jnp.float32), jnp.zeros((HIDDEN,), jnp.float32)),
            "ffn1": dense(HIDDEN, INTERMEDIATE),
            "ffn2": dense(INTERMEDIATE, HIDDEN),
            "ln2": (jnp.ones((HIDDEN,), jnp.float32), jnp.zeros((HIDDEN,), jnp.float32)),
        })
    return params


def pack_params(params):
    """Repack natural HF-style weights into the stacked, per-head kernel layout."""
    H, I, nh, hd = HIDDEN, INTERMEDIATE, N_HEADS, HEAD_DIM

    def split_w(w):   # (H, H) -> (nh, H, hd); head h = columns [h*hd:(h+1)*hd]
        return w.reshape(H, nh, hd).transpose(1, 0, 2)

    def split_b(b):   # (H,) -> (nh, 1, hd)
        return b.reshape(nh, 1, hd)

    def pad_to(v, width):
        return jnp.pad(v, (0, width - v.shape[0]))

    wqkv, bqkv, wo, w1, w2, vecs = [], [], [], [], [], []
    for lyr in params["layers"]:
        qw, qb = lyr["q"]; kw, kb = lyr["k"]; vw, vb = lyr["v"]
        wqkv.append(jnp.concatenate([split_w(qw), split_w(kw), split_w(vw)], axis=0))
        bqkv.append(jnp.concatenate([split_b(qb), split_b(kb), split_b(vb)], axis=0))
        ow, ob = lyr["o"]
        wo.append(ow.reshape(nh, hd, H))              # rows h*hd:(h+1)*hd of Wo
        f1w, f1b = lyr["ffn1"]; f2w, f2b = lyr["ffn2"]
        w1.append(f1w); w2.append(f2w)
        ln1g, ln1b = lyr["ln1"]; ln2g, ln2b = lyr["ln2"]
        # packed small vectors: one (8, I) tile per layer
        vecs.append(jnp.stack([
            pad_to(ob, I), pad_to(ln1g, I), pad_to(ln1b, I), f1b,
            pad_to(f2b, I), pad_to(ln2g, I), pad_to(ln2b, I),
            jnp.zeros((I,), jnp.float32)], axis=0))

    cls_w, cls_b = params["classifier"]
    cls_w_pad = jnp.zeros((H, CLS_PAD), jnp.float32).at[:, :N_CLASSES].set(cls_w)
    cls_b_pad = jnp.zeros((CLS_PAD,), jnp.float32).at[:N_CLASSES].set(cls_b)

    return {
        "word_emb": params["word_emb"],
        "pos_emb": params["pos_emb"],
        "type_emb": params["type_emb"],
        "emb_ln": jnp.stack(params["emb_ln"], axis=0),   # (2, H): [gamma; beta]
        "wqkv": jnp.stack(wqkv),                         # (L, 3nh, H, hd)
        "bqkv": jnp.stack(bqkv),                         # (L, 3nh, 1, hd)
        "wo":   jnp.stack(wo),                           # (L, nh, hd, H)
        "w1":   jnp.stack(w1),                           # (L, H, I)
        "w2":   jnp.stack(w2),                           # (L, I, H)
        "vecs": jnp.stack(vecs),                         # (L, 8, I)
        "pool_w": params["pooler"][0],
        "pool_b": params["pooler"][1],
        "cls_w_pad": cls_w_pad,
        "cls_b_pad": cls_b_pad,
    }


# ---------------------------------------------------------------------------
# Forward pass: BERT encoder -> pooled CLS -> dropout(eval) -> linear head
# ---------------------------------------------------------------------------
def genres_classifier_forward(packed, input_ids, attention_mask, token_type_ids):
    B, S = input_ids.shape

    # embeddings (gathers are XLA glue; their LayerNorm runs fused in the encoder kernel)
    emb = (packed["word_emb"][input_ids]
           + packed["pos_emb"][jnp.arange(S)][None, :, :]
           + packed["type_emb"][token_type_ids])
    x_emb = emb.reshape(B * S, HIDDEN).astype(jnp.float32)
    # TODO(synk): internal nn.Dropout(p=0.1) layers are identity in eval mode.

    # additive attention mask, kept in f32 (-1e9 is f32-safe)
    mask_bias = ((1.0 - attention_mask.astype(jnp.float32)) * -1e9).reshape(B, 1, S)

    x = encoder_stack(x_emb, mask_bias, packed, B, S)         # one fused pallas_call

    cls = x.reshape(B, S, HIDDEN)[:, 0, :]                    # [B, H] (CLS token)
    logits_pad = pooler_classifier(cls, packed["pool_w"], packed["pool_b"],
                                   packed["cls_w_pad"], packed["cls_b_pad"])
    return logits_pad[:, :N_CLASSES]                          # [B, n_classes]


if __name__ == "__main__":
    key = jax.random.PRNGKey(0)
    pkey, ikey = jax.random.split(key)
    packed = pack_params(init_params(pkey))

    B, S = 2, 8
    input_ids = jax.random.randint(ikey, (B, S), 0, VOCAB, dtype=jnp.int32)
    attention_mask = jnp.ones((B, S), jnp.int32).at[1, 6:].set(0)
    token_type_ids = jnp.zeros((B, S), jnp.int32)

    logits = genres_classifier_forward(packed, input_ids, attention_mask, token_type_ids)
    logits = jax.block_until_ready(logits)
    assert logits.shape == (B, N_CLASSES) and logits.dtype == jnp.float32
    print("KERNEL_OK")
</pallas_src>

<mosaic_0001>
module attributes {stable_mosaic.version = 11 : i64} {
  func.func @_encoder_stack_kernel(%arg0: i32, %arg1: i32, %arg2: memref<8x32xf32, #tpu.memory_space<vmem>>, %arg3: memref<1x1x8xf32, #tpu.memory_space<vmem>>, %arg4: memref<2x32xf32, #tpu.memory_space<vmem>>, %arg5: memref<1x6x32x16xf32, #tpu.memory_space<vmem>>, %arg6: memref<1x6x1x16xf32, #tpu.memory_space<vmem>>, %arg7: memref<1x2x16x32xf32, #tpu.memory_space<vmem>>, %arg8: memref<1x32x64xf32, #tpu.memory_space<vmem>>, %arg9: memref<1x64x32xf32, #tpu.memory_space<vmem>>, %arg10: memref<1x8x64xf32, #tpu.memory_space<vmem>>, %arg11: memref<8x32xf32, #tpu.memory_space<vmem>>, %arg12: memref<8x32xf32, #tpu.memory_space<vmem>>) attributes {dimension_semantics = [#tpu.dimension_semantics<parallel>, #tpu.dimension_semantics<arbitrary>], iteration_bounds = array<i64: 2, 2>, scalar_prefetch = 0 : i64, scratch_operands = 1 : i64, tpu.core_type = #tpu.core_type<tc>, window_params = [{transform_indices = @transform_0, window_bounds = array<i64: 8, 32>}, {transform_indices = @transform_1, window_bounds = array<i64: 1, 1, 8>}, {pipeline_mode = #tpu.pipeline_mode<synchronous>, transform_indices = @transform_2, window_bounds = array<i64: 2, 32>}, {transform_indices = @transform_3, window_bounds = array<i64: 1, 6, 32, 16>}, {transform_indices = @transform_4, window_bounds = array<i64: 1, 6, 1, 16>}, {transform_indices = @transform_5, window_bounds = array<i64: 1, 2, 16, 32>}, {transform_indices = @transform_6, window_bounds = array<i64: 1, 32, 64>}, {transform_indices = @transform_7, window_bounds = array<i64: 1, 64, 32>}, {transform_indices = @transform_8, window_bounds = array<i64: 1, 8, 64>}, {transform_indices = @transform_9, window_bounds = array<i64: 8, 32>}]} {
    %c0_i32 = arith.constant 0 : i32
    %0 = arith.cmpi eq, %arg1, %c0_i32 : i32
    %1 = arith.extui %0 : i1 to i32
    %c0_i32_0 = arith.constant 0 : i32
    %2 = arith.cmpi ne, %1, %c0_i32_0 : i32
    scf.if %2 {
      %c0_52 = arith.constant 0 : index
      %c0_53 = arith.constant 0 : index
      %120 = vector.load %arg4[%c0_52, %c0_53] : memref<2x32xf32, #tpu.memory_space<vmem>>, vector<1x32xf32>
      %c1 = arith.constant 1 : index
      %c0_54 = arith.constant 0 : index
      %121 = vector.load %arg4[%c1, %c0_54] : memref<2x32xf32, #tpu.memory_space<vmem>>, vector<1x32xf32>
      %c0_55 = arith.constant 0 : index
      %c0_56 = arith.constant 0 : index
      %122 = vector.load %arg2[%c0_55, %c0_56] : memref<8x32xf32, #tpu.memory_space<vmem>>, vector<8x32xf32>
      %cst_57 = arith.constant dense<0.000000e+00> : vector<8xf32>
      %123 = vector.multi_reduction <add>, %122, %cst_57 [1] : vector<8x32xf32> to vector<8xf32>
      %124 = vector.shape_cast %123 : vector<8xf32> to vector<8x1xf32>
      %cst_58 = arith.constant 3.200000e+01 : f32
      %125 = vector.broadcast %cst_58 : f32 to vector<8x1xf32>
      %126 = arith.divf %124, %125 : vector<8x1xf32>
      %127 = vector.broadcast %126 : vector<8x1xf32> to vector<8x32xf32>
      %128 = arith.subf %122, %127 : vector<8x32xf32>
      %129 = arith.mulf %128, %128 : vector<8x32xf32>
      %cst_59 = arith.constant dense<0.000000e+00> : vector<8xf32>
      %130 = vector.multi_reduction <add>, %129, %cst_59 [1] : vector<8x32xf32> to vector<8xf32>
      %131 = vector.shape_cast %130 : vector<8xf32> to vector<8x1xf32>
      %cst_60 = arith.constant 3.200000e+01 : f32
      %132 = vector.broadcast %cst_60 : f32 to vector<8x1xf32>
      %133 = arith.divf %131, %132 : vector<8x1xf32>
      %cst_61 = arith.constant 9.99999996E-13 : f32
      %134 = vector.broadcast %cst_61 : f32 to vector<8x1xf32>
      %135 = arith.addf %133, %134 : vector<8x1xf32>
      %136 = math.rsqrt %135 : vector<8x1xf32>
      %137 = vector.broadcast %136 : vector<8x1xf32> to vector<8x32xf32>
      %138 = arith.mulf %128, %137 : vector<8x32xf32>
      %139 = vector.broadcast %120 : vector<1x32xf32> to vector<8x32xf32>
      %140 = arith.mulf %138, %139 : vector<8x32xf32>
      %141 = vector.broadcast %121 : vector<1x32xf32> to vector<8x32xf32>
      %142 = arith.addf %140, %141 : vector<8x32xf32>
      %c0_62 = arith.constant 0 : index
      %c0_63 = arith.constant 0 : index
      %143 = vector.load %arg12[%c0_62, %c0_63] : memref<8x32xf32, #tpu.memory_space<vmem>>, vector<8x32xf32>
      tpu.vector_store %arg12[%c0_62, %c0_63], %142 {strides = array<i32>} : memref<8x32xf32, #tpu.memory_space<vmem>>, vector<8x32xf32>,
    } else {
    }
    %c0 = arith.constant 0 : index
    %c0_1 = arith.constant 0 : index
    %3 = vector.load %arg12[%c0, %c0_1] : memref<8x32xf32, #tpu.memory_space<vmem>>, vector<8x32xf32>
    %c0_2 = arith.constant 0 : index
    %c0_3 = arith.constant 0 : index
    %c0_4 = arith.constant 0 : index
    %4 = vector.load %arg10[%c0_2, %c0_3, %c0_4] : memref<1x8x64xf32, #tpu.memory_space<vmem>>, vector<1x8x64xf32>
    %5 = vector.shape_cast %4 : vector<1x8x64xf32> to vector<8x64xf32>
    %6 = vector.extract_strided_slice %5 {offsets = [0, 0], sizes = [1, 32], strides = [1, 1]} : vector<8x64xf32> to vector<1x32xf32>
    %7 = vector.extract_strided_slice %5 {offsets = [1, 0], sizes = [1, 32], strides = [1, 1]} : vector<8x64xf32> to vector<1x32xf32>
    %8 = vector.extract_strided_slice %5 {offsets = [2, 0], sizes = [1, 32], strides = [1, 1]} : vector<8x64xf32> to vector<1x32xf32>
    %9 = vector.extract_strided_slice %5 {offsets = [3, 0], sizes = [1, 64], strides = [1, 1]} : vector<8x64xf32> to vector<1x64xf32>
    %10 = vector.extract_strided_slice %5 {offsets = [4, 0], sizes = [1, 32], strides = [1, 1]} : vector<8x64xf32> to vector<1x32xf32>
    %11 = vector.extract_strided_slice %5 {offsets = [5, 0], sizes = [1, 32], strides = [1, 1]} : vector<8x64xf32> to vector<1x32xf32>
    %12 = vector.extract_strided_slice %5 {offsets = [6, 0], sizes = [1, 32], strides = [1, 1]} : vector<8x64xf32> to vector<1x32xf32>
    %c0_5 = arith.constant 0 : index
    %c0_6 = arith.constant 0 : index
    %c0_7 = arith.constant 0 : index
    %c0_8 = arith.constant 0 : index
    %13 = vector.load %arg5[%c0_5, %c0_6, %c0_7, %c0_8] : memref<1x6x32x16xf32, #tpu.memory_space<vmem>>, vector<1x6x32x16xf32>
    %14 = vector.shape_cast %13 : vector<1x6x32x16xf32> to vector<6x32x16xf32>
    %c0_9 = arith.constant 0 : index
    %c0_10 = arith.constant 0 : index
    %c0_11 = arith.constant 0 : index
    %c0_12 = arith.constant 0 : index
    %15 = vector.load %arg6[%c0_9, %c0_10, %c0_11, %c0_12] : memref<1x6x1x16xf32, #tpu.memory_space<vmem>>, vector<1x6x1x16xf32>
    %16 = vector.shape_cast %15 : vector<1x6x1x16xf32> to vector<6x1x16xf32>
    %17 = vector.shape_cast %3 : vector<8x32xf32> to vector<1x8x32xf32>
    %18 = vector.shape_cast %17 : vector<1x8x32xf32> to vector<1x8x32xf32>
    %19 = vector.broadcast %18 : vector<1x8x32xf32> to vector<6x8x32xf32>
    "tpu.trace_start"() <{level = 10 : i32, message = "gsh,ghd->gsd"}> : () -> ()
    %cst = arith.constant dense<0.000000e+00> : vector<6x8x16xf32>
    %20 = tpu.matmul %19, %14, %cst {dimension_numbers = #tpu.dot_dimension_numbers<[2], [1], [1], [2], [0, 0, 0, 1, 1, 2], [0], [0]>} : vector<6x8x32xf32>, vector<6x32x16xf32>, vector<6x8x16xf32> -> vector<6x8x16xf32>
    "tpu.trace_stop"() : () -> ()
    %21 = vector.broadcast %16 : vector<6x1x16xf32> to vector<6x8x16xf32>
    %22 = arith.addf %20, %21 : vector<6x8x16xf32>
    %23 = vector.extract_strided_slice %22 {offsets = [0, 0, 0], sizes = [2, 8, 16], strides = [1, 1, 1]} : vector<6x8x16xf32> to vector<2x8x16xf32>
    %cst_13 = arith.constant 2.500000e-01 : f32
    %24 = vector.broadcast %cst_13 : f32 to vector<2x8x16xf32>
    %25 = arith.mulf %23, %24 : vector<2x8x16xf32>
    %26 = vector.extract_strided_slice %22 {offsets = [2, 0, 0], sizes = [2, 8, 16], strides = [1, 1, 1]} : vector<6x8x16xf32> to vector<2x8x16xf32>
    %27 = vector.extract_strided_slice %22 {offsets = [4, 0, 0], sizes = [2, 8, 16], strides = [1, 1, 1]} : vector<6x8x16xf32> to vector<2x8x16xf32>
    "tpu.trace_start"() <{level = 10 : i32, message = "hqd,hkd->hqk"}> : () -> ()
    %cst_14 = arith.constant dense<0.000000e+00> : vector<2x8x8xf32>
    %28 = tpu.matmul %25, %26, %cst_14 {dimension_numbers = #tpu.dot_dimension_numbers<[2], [2], [1], [1], [0, 0, 0, 1, 1, 1], [0], [0]>} : vector<2x8x16xf32>, vector<2x8x16xf32>, vector<2x8x8xf32> -> vector<2x8x8xf32>
    "tpu.trace_stop"() : () -> ()
    %c0_15 = arith.constant 0 : index
    %c0_16 = arith.constant 0 : index
    %c0_17 = arith.constant 0 : index
    %29 = vector.load %arg3[%c0_15, %c0_16, %c0_17] : memref<1x1x8xf32, #tpu.memory_space<vmem>>, vector<1x1x8xf32>
    %30 = vector.shape_cast %29 : vector<1x1x8xf32> to vector<1x8xf32>
    %31 = vector.shape_cast %30 : vector<1x8xf32> to vector<1x1x8xf32>
    %32 = vector.broadcast %31 : vector<1x1x8xf32> to vector<2x8x8xf32>
    %33 = arith.addf %28, %32 : vector<2x8x8xf32>
    %cst_18 = arith.constant dense<0xFF800000> : vector<2x8xf32>
    %34 = vector.multi_reduction <maximumf>, %33, %cst_18 [2] : vector<2x8x8xf32> to vector<2x8xf32>
    %35 = vector.shape_cast %34 : vector<2x8xf32> to vector<2x8x1xf32>
    %36 = vector.broadcast %35 : vector<2x8x1xf32> to vector<2x8x8xf32>
    %37 = arith.subf %33, %36 : vector<2x8x8xf32>
    %38 = math.exp %37 : vector<2x8x8xf32>
    %cst_19 = arith.constant dense<0.000000e+00> : vector<2x8xf32>
    %39 = vector.multi_reduction <add>, %38, %cst_19 [2] : vector<2x8x8xf32> to vector<2x8xf32>
    %40 = vector.shape_cast %39 : vector<2x8xf32> to vector<2x8x1xf32>
    %41 = tpu.reciprocal %40 {approx = true} : vector<2x8x1xf32> -> vector<2x8x1xf32>
    %42 = vector.broadcast %41 : vector<2x8x1xf32> to vector<2x8x8xf32>
    %43 = arith.mulf %38, %42 : vector<2x8x8xf32>
    "tpu.trace_start"() <{level = 10 : i32, message = "hqk,hkd->hqd"}> : () -> ()
    %cst_20 = arith.constant dense<0.000000e+00> : vector<2x8x16xf32>
    %44 = tpu.matmul %43, %27, %cst_20 {dimension_numbers = #tpu.dot_dimension_numbers<[2], [1], [1], [2], [0, 0, 0, 1, 1, 2], [0], [0]>} : vector<2x8x8xf32>, vector<2x8x16xf32>, vector<2x8x16xf32> -> vector<2x8x16xf32>
    "tpu.trace_stop"() : () -> ()
    %c0_21 = arith.constant 0 : index
    %c0_22 = arith.constant 0 : index
    %c0_23 = arith.constant 0 : index
    %c0_24 = arith.constant 0 : index
    %45 = vector.load %arg7[%c0_21, %c0_22, %c0_23, %c0_24] : memref<1x2x16x32xf32, #tpu.memory_space<vmem>>, vector<1x2x16x32xf32>
    %46 = vector.shape_cast %45 : vector<1x2x16x32xf32> to vector<2x16x32xf32>
    "tpu.trace_start"() <{level = 10 : i32, message = "hsd,hdo->hso"}> : () -> ()
    %cst_25 = arith.constant dense<0.000000e+00> : vector<2x8x32xf32>
    %47 = tpu.matmul %44, %46, %cst_25 {dimension_numbers = #tpu.dot_dimension_numbers<[2], [1], [1], [2], [0, 0, 0, 1, 1, 2], [0], [0]>} : vector<2x8x16xf32>, vector<2x16x32xf32>, vector<2x8x32xf32> -> vector<2x8x32xf32>
    "tpu.trace_stop"() : () -> ()
    %cst_26 = arith.constant dense<0.000000e+00> : vector<8x32xf32>
    %48 = vector.multi_reduction <add>, %47, %cst_26 [0] : vector<2x8x32xf32> to vector<8x32xf32>
    %49 = vector.broadcast %6 : vector<1x32xf32> to vector<8x32xf32>
    %50 = arith.addf %48, %49 : vector<8x32xf32>
    %51 = arith.addf %50, %3 : vector<8x32xf32>
    %cst_27 = arith.constant dense<0.000000e+00> : vector<8xf32>
    %52 = vector.multi_reduction <add>, %51, %cst_27 [1] : vector<8x32xf32> to vector<8xf32>
    %53 = vector.shape_cast %52 : vector<8xf32> to vector<8x1xf32>
    %cst_28 = arith.constant 3.200000e+01 : f32
    %54 = vector.broadcast %cst_28 : f32 to vector<8x1xf32>
    %55 = arith.divf %53, %54 : vector<8x1xf32>
    %56 = vector.broadcast %55 : vector<8x1xf32> to vector<8x32xf32>
    %57 = arith.subf %51, %56 : vector<8x32xf32>
    %58 = arith.mulf %57, %57 : vector<8x32xf32>
    %cst_29 = arith.constant dense<0.000000e+00> : vector<8xf32>
    %59 = vector.multi_reduction <add>, %58, %cst_29 [1] : vector<8x32xf32> to vector<8xf32>
    %60 = vector.shape_cast %59 : vector<8xf32> to vector<8x1xf32>
    %cst_30 = arith.constant 3.200000e+01 : f32
    %61 = vector.broadcast %cst_30 : f32 to vector<8x1xf32>
    %62 = arith.divf %60, %61 : vector<8x1xf32>
    %cst_31 = arith.constant 9.99999996E-13 : f32
    %63 = vector.broadcast %cst_31 : f32 to vector<8x1xf32>
    %64 = arith.addf %62, %63 : vector<8x1xf32>
    %65 = math.rsqrt %64 : vector<8x1xf32>
    %66 = vector.broadcast %65 : vector<8x1xf32> to vector<8x32xf32>
    %67 = arith.mulf %57, %66 : vector<8x32xf32>
    %68 = vector.broadcast %7 : vector<1x32xf32> to vector<8x32xf32>
    %69 = arith.mulf %67, %68 : vector<8x32xf32>
    %70 = vector.broadcast %8 : vector<1x32xf32> to vector<8x32xf32>
    %71 = arith.addf %69, %70 : vector<8x32xf32>
    %c0_32 = arith.constant 0 : index
    %c0_33 = arith.constant 0 : index
    %c0_34 = arith.constant 0 : index
    %72 = vector.load %arg8[%c0_32, %c0_33, %c0_34] : memref<1x32x64xf32, #tpu.memory_space<vmem>>, vector<1x32x64xf32>
    %73 = vector.shape_cast %72 : vector<1x32x64xf32> to vector<32x64xf32>
    %cst_35 = arith.constant dense<0.000000e+00> : vector<8x64xf32>
    %74 = tpu.matmul %71, %73, %cst_35 {dimension_numbers = #tpu.dot_dimension_numbers<[1], [0], [0], [1], [0, 0, 1, 1], [], []>} : vector<8x32xf32>, vector<32x64xf32>, vector<8x64xf32> -> vector<8x64xf32>
    %75 = vector.broadcast %9 : vector<1x64xf32> to vector<8x64xf32>
    %76 = arith.addf %74, %75 : vector<8x64xf32>
    %77 = arith.mulf %76, %76 : vector<8x64xf32>
    %78 = arith.mulf %76, %77 : vector<8x64xf32>
    %cst_36 = arith.constant 4.471500e-02 : f32
    %79 = vector.broadcast %cst_36 : f32 to vector<8x64xf32>
    %80 = arith.mulf %79, %78 : vector<8x64xf32>
    %81 = arith.addf %76, %80 : vector<8x64xf32>
    %cst_37 = arith.constant 0.797884583 : f32
    %82 = vector.broadcast %cst_37 : f32 to vector<8x64xf32>
    %83 = arith.mulf %82, %81 : vector<8x64xf32>
    %84 = math.tanh %83 : vector<8x64xf32>
    %cst_38 = arith.constant 1.000000e+00 : f32
    %85 = vector.broadcast %cst_38 : f32 to vector<8x64xf32>
    %86 = arith.addf %85, %84 : vector<8x64xf32>
    %cst_39 = arith.constant 5.000000e-01 : f32
    %87 = vector.broadcast %cst_39 : f32 to vector<8x64xf32>
    %88 = arith.mulf %87, %86 : vector<8x64xf32>
    %89 = arith.mulf %76, %88 : vector<8x64xf32>
    %c0_40 = arith.constant 0 : index
    %c0_41 = arith.constant 0 : index
    %c0_42 = arith.constant 0 : index
    %90 = vector.load %arg9[%c0_40, %c0_41, %c0_42] : memref<1x64x32xf32, #tpu.memory_space<vmem>>, vector<1x64x32xf32>
    %91 = vector.shape_cast %90 : vector<1x64x32xf32> to vector<64x32xf32>
    %cst_43 = arith.constant dense<0.000000e+00> : vector<8x32xf32>
    %92 = tpu.matmul %89, %91, %cst_43 {dimension_numbers = #tpu.dot_dimension_numbers<[1], [0], [0], [1], [0, 0, 1, 1], [], []>} : vector<8x64xf32>, vector<64x32xf32>, vector<8x32xf32> -> vector<8x32xf32>
    %93 = vector.broadcast %10 : vector<1x32xf32> to vector<8x32xf32>
    %94 = arith.addf %92, %93 : vector<8x32xf32>
    %95 = arith.addf %94, %71 : vector<8x32xf32>
    %cst_44 = arith.constant dense<0.000000e+00> : vector<8xf32>
    %96 = vector.multi_reduction <add>, %95, %cst_44 [1] : vector<8x32xf32> to vector<8xf32>
    %97 = vector.shape_cast %96 : vector<8xf32> to vector<8x1xf32>
    %cst_45 = arith.constant 3.200000e+01 : f32
    %98 = vector.broadcast %cst_45 : f32 to vector<8x1xf32>
    %99 = arith.divf %97, %98 : vector<8x1xf32>
    %100 = vector.broadcast %99 : vector<8x1xf32> to vector<8x32xf32>
    %101 = arith.subf %95, %100 : vector<8x32xf32>
    %102 = arith.mulf %101, %101 : vector<8x32xf32>
    %cst_46 = arith.constant dense<0.000000e+00> : vector<8xf32>
    %103 = vector.multi_reduction <add>, %102, %cst_46 [1] : vector<8x32xf32> to vector<8xf32>
    %104 = vector.shape_cast %103 : vector<8xf32> to vector<8x1xf32>
    %cst_47 = arith.constant 3.200000e+01 : f32
    %105 = vector.broadcast %cst_47 : f32 to vector<8x1xf32>
    %106 = arith.divf %104, %105 : vector<8x1xf32>
    %cst_48 = arith.constant 9.99999996E-13 : f32
    %107 = vector.broadcast %cst_48 : f32 to vector<8x1xf32>
    %108 = arith.addf %106, %107 : vector<8x1xf32>
    %109 = math.rsqrt %108 : vector<8x1xf32>
    %110 = vector.broadcast %109 : vector<8x1xf32> to vector<8x32xf32>
    %111 = arith.mulf %101, %110 : vector<8x32xf32>
    %112 = vector.broadcast %11 : vector<1x32xf32> to vector<8x32xf32>
    %113 = arith.mulf %111, %112 : vector<8x32xf32>
    %114 = vector.broadcast %12 : vector<1x32xf32> to vector<8x32xf32>
    %115 = arith.addf %113, %114 : vector<8x32xf32>
    %c0_49 = arith.constant 0 : index
    %c0_50 = arith.constant 0 : index
    %116 = vector.load %arg12[%c0_49, %c0_50] : memref<8x32xf32, #tpu.memory_space<vmem>>, vector<8x32xf32>
    tpu.vector_store %arg12[%c0_49, %c0_50], %115 {strides = array<i32>} : memref<8x32xf32, #tpu.memory_space<vmem>>, vector<8x32xf32>,
    %c1_i32 = arith.constant 1 : i32
    %117 = arith.cmpi eq, %arg1, %c1_i32 : i32
    %118 = arith.extui %117 : i1 to i32
    %c0_i32_51 = arith.constant 0 : i32
    %119 = arith.cmpi ne, %118, %c0_i32_51 : i32
    scf.if %119 {
      %c0_52 = arith.constant 0 : index
      %c0_53 = arith.constant 0 : index
      %120 = vector.load %arg11[%c0_52, %c0_53] : memref<8x32xf32, #tpu.memory_space<vmem>>, vector<8x32xf32>
      tpu.vector_store %arg11[%c0_52, %c0_53], %115 {strides = array<i32>} : memref<8x32xf32, #tpu.memory_space<vmem>>, vector<8x32xf32>,
    } else {
    }
    return
  }
  func.func @transform_0(%arg0: i32, %arg1: i32) -> (i32, i32) {
    %c0_i32 = arith.constant 0 : i32
    %c0_i32_0 = arith.constant 0 : i32
    return %arg0, %c0_i32 : i32, i32
  }
  func.func @transform_1(%arg0: i32, %arg1: i32) -> (i32, i32, i32) {
    %c0_i32 = arith.constant 0 : i32
    %c0_i32_0 = arith.constant 0 : i32
    %c0_i32_1 = arith.constant 0 : i32
    return %arg0, %c0_i32, %c0_i32_0 : i32, i32, i32
  }
  func.func @transform_2(%arg0: i32, %arg1: i32) -> (i32, i32) {
    %c0_i32 = arith.constant 0 : i32
    %c0_i32_0 = arith.constant 0 : i32
    %c0_i32_1 = arith.constant 0 : i32
    return %c0_i32, %c0_i32_0 : i32, i32
  }
  func.func @transform_3(%arg0: i32, %arg1: i32) -> (i32, i32, i32, i32) {
    %c0_i32 = arith.constant 0 : i32
    %c0_i32_0 = arith.constant 0 : i32
    %c0_i32_1 = arith.constant 0 : i32
    %c0_i32_2 = arith.constant 0 : i32
    return %arg1, %c0_i32, %c0_i32_0, %c0_i32_1 : i32, i32, i32, i32
  }
  func.func @transform_4(%arg0: i32, %arg1: i32) -> (i32, i32, i32, i32) {
    %c0_i32 = arith.constant 0 : i32
    %c0_i32_0 = arith.constant 0 : i32
    %c0_i32_1 = arith.constant 0 : i32
    %c0_i32_2 = arith.constant 0 : i32
    return %arg1, %c0_i32, %c0_i32_0, %c0_i32_1 : i32, i32, i32, i32
  }
  func.func @transform_5(%arg0: i32, %arg1: i32) -> (i32, i32, i32, i32) {
    %c0_i32 = arith.constant 0 : i32
    %c0_i32_0 = arith.constant 0 : i32
    %c0_i32_1 = arith.constant 0 : i32
    %c0_i32_2 = arith.constant 0 : i32
    return %arg1, %c0_i32, %c0_i32_0, %c0_i32_1 : i32, i32, i32, i32
  }
  func.func @transform_6(%arg0: i32, %arg1: i32) -> (i32, i32, i32) {
    %c0_i32 = arith.constant 0 : i32
    %c0_i32_0 = arith.constant 0 : i32
    %c0_i32_1 = arith.constant 0 : i32
    return %arg1, %c0_i32, %c0_i32_0 : i32, i32, i32
  }
  func.func @transform_7(%arg0: i32, %arg1: i32) -> (i32, i32, i32) {
    %c0_i32 = arith.constant 0 : i32
    %c0_i32_0 = arith.constant 0 : i32
    %c0_i32_1 = arith.constant 0 : i32
    return %arg1, %c0_i32, %c0_i32_0 : i32, i32, i32
  }
  func.func @transform_8(%arg0: i32, %arg1: i32) -> (i32, i32, i32) {
    %c0_i32 = arith.constant 0 : i32
    %c0_i32_0 = arith.constant 0 : i32
    %c0_i32_1 = arith.constant 0 : i32
    return %arg1, %c0_i32, %c0_i32_0 : i32, i32, i32
  }
  func.func @transform_9(%arg0: i32, %arg1: i32) -> (i32, i32) {
    %c0_i32 = arith.constant 0 : i32
    %c0_i32_0 = arith.constant 0 : i32
    return %arg0, %c0_i32 : i32, i32
  }
}

</mosaic_0001>

<bundles_post_ra>
// kernel: tpu_custom_call.1
= control target key start
LH: loop header
LB: loop body
LE: loop exit
PB: predicated region body
PF: predicated region fallthrough
CT: control target
= control target key end

     0   :  { %s2762_s0 = inlined_call_operand.vmem [shape: f32[16,32], index: 0, kind: input, shape index: {}]   ;;  %s2763_s1 = inlined_call_operand.vmem [shape: f32[2,1,8], index: 1, kind: input, shape index: {}]   ;;  %s2764_s2 = inlined_call_operand.vmem [shape: f32[2,32], index: 2, kind: input, shape index: {}]   ;;  %s2765_s3 = inlined_call_operand.vmem [shape: f32[2,6,32,16], index: 3, kind: input, shape index: {}]   ;;  %s2766_s4 = inlined_call_operand.vmem [shape: f32[2,6,1,16], index: 4, kind: input, shape index: {}]   ;;  %s2767_s5 = inlined_call_operand.vmem [shape: f32[2,2,16,32], index: 5, kind: input, shape index: {}]   ;;  %s2768_s6 = inlined_call_operand.vmem [shape: f32[2,32,64], index: 6, kind: input, shape index: {}]   ;;  %s2769_s7 = inlined_call_operand.vmem [shape: f32[2,64,32], index: 7, kind: input, shape index: {}]   ;;  %s2770_s8 = inlined_call_operand.vmem [shape: f32[2,8,64], index: 8, kind: input, shape index: {}]   ;;  %s2771_s9 = inlined_call_operand.hbm [shape: f32[16,32], index: 9, kind: output, shape index: {}]  }
   0x1   :  { %2785 = sst [smem:[#allocation17_spill]] %s2762_s0 }
   0x2   :  { %2786 = sst [smem:[#allocation18_spill]] %s2765_s3 }
   0x3   :  { %2787 = sst [smem:[#allocation19_spill]] %s2771_s9 }
   0x4   :  { %14 = vsyncpa [#allocation4], 0 }
   0x5   :  { %16 = vsyncpa [#allocation4 + $0x1], 0  ;;  %s2417_s30 = smov 0   ;;  %s2419_s10 = smov 0  }
   0x6   :  { %s2421_s11 = smov 0   ;;  %s2423_s12 = smov 0  }
   0x7   :  { %s2425_s13 = smov 0   ;;  %s2427_s14 = smov 0  }
   0x8   :  { %s2429_s15 = smov 0   ;;  %s2431_s16 = smov 0  }
   0x9 LB: > { %2788 = sst [smem:[#allocation6_spill]] %s2333_s30  ;;  %s1878_s17 = sadd.s32 4294967295, %s2361_s16   ;;  %s2361_s16 = sphi %s2431_s16, %s22_s16   ;;  %s2357_s15 = sphi %s2429_s15, %s2817_s15   ;;  %s2353_s14 = sphi %s2427_s14, %s2816_s14   ;;  %s2349_s13 = sphi %s2425_s13, %s2815_s13   ;;  %s2345_s12 = sphi %s2423_s12, %s2814_s12   ;;  %s2341_s11 = sphi %s2421_s11, %s2813_s11   ;;  %s2337_s10 = sphi %s2419_s10, %s2812_s10   ;;  %s2333_s30 = sphi %s2417_s30, %s2811_s30  }
   0xa   : > { %2789 = sst [smem:[#allocation7_spill]] %s2337_s10  ;;  %s1879_s18 = sadd.s32 4294967294, %s2361_s16  }
   0xb   : > { %2790 = sst [smem:[#allocation8_spill]] %s2341_s11  ;;  %s31_s19 = sadd.s32 1, %s2353_s14 }
   0xc   : > { %2791 = sst [smem:[#allocation9_spill]] %s2353_s14  ;;  %p32_p0 = scmp.ge.s32.totalorder %s31_s19, 2 }
   0xd   : > { %2792 = sst [smem:[#allocation10_spill]] %s2357_s15  ;;  %s34_s20 = sadd.s32 1, %s2357_s15 }
   0xe   : > { %2793 = sst [smem:[#allocation11_spill]] %s2361_s16  ;;  %p280_p1 = scmp.ne.s32.totalorder %s2341_s11, %s2337_s10 }
   0xf   : > { %p281_p2 = scmp.eq.s32.totalorder %s1878_s17, 3  ;;  %s2819_s19 = smov (%p32_p0, %s31_s19), 0 }
  0x10   : > { %2794 = sst [smem:[#allocation12_spill]] %s2819_s19  ;;  %s2821_s20 = smov (!%p32_p0, %s34_s20), %s2357_s15 }
  0x11   : > { %p2466_p3 = por %p281_p2, %p280_p1  ;;  %p286_p4 = scmp.ne.s32.totalorder %s2337_s10, %s2333_s30 }
  0x12   : > { %p36_p5 = scmp.ge.s32.totalorder %s2821_s20, 2  ;;  %p287_p6 = scmp.eq.s32.totalorder %s1879_s18, 3 }
  0x13   : > { %s2795_s21 = scalar_select %p2466_p3, 1, 0 }
  0x14   : > { %p1882_p7 = scmp.ge.s32.totalorder %s2361_s16, 1  ;;  %p367_p8 = scmp.lt.s32.totalorder %s2361_s16, 5 }
  0x15   : > { %2796 = sst [smem:[#allocation13_spill]] %s2795_s21  ;;  %s2823_s20 = smov (%p36_p5, %s2821_s20), 0 }
  0x16   : > { %2797 = sst [smem:[#allocation14_spill]] %s2823_s20  ;;  %p2476_p9 = por %p287_p6, %p286_p4 }
  0x17   : > { %p368_p10 = pnand %p1882_p7, %p367_p8  ;;  %s267_s23 = ssub.s32 %s2357_s15, %s2823_s20 }
  0x18   : > { %s2798_s22 = scalar_select %p2476_p9, 1, 0 }
  0x19   : > { %s270_s24 = sadd.s32 1, %s2341_s11  ;;  %p268_p11 = scmp.eq.s32.totalorder %s267_s23, 0 }
  0x1a   : > { %2799 = sst [smem:[#allocation15_spill]] %s2798_s22  ;;  %371 = sbr.rel (%p368_p10) target bundleno = 2659 (0xa63), region = 56 }
  0x1b   : > { %s2484_s25 = scalar_select %p268_p11, %s2341_s11, %s270_s24  }
  0x1c   : > { %s2775_s26 = sand.u32 (!%p368_p10), 1, %s2337_s10   ;;  %p433_p12 = scmp.lt.s32.totalorder (!%p368_p10), %s2349_s13, 1 }
  0x1d   : > { %2800 = sst [smem:[#allocation16_spill]] %s2484_s25  ;;  %s2490_s27 = sshll.u32 (!%p368_p10), %s2775_s26, 3 }
  0x1e   : > { %p440_p13 = scmp.lt.s32.totalorder (!%p368_p10), %s2345_s12, 1  ;;  %s2801_s0 = sld [smem:[#allocation17_spill]] (!%p368_p10) }
  0x1f   : > { %s2802_s3 = sld [smem:[#allocation18_spill]] (!%p368_p10)  ;;  %s432_s10 = scalar_lea.vmem (!%p368_p10), [#allocation3], %s2490_s27 }
  0x20   : > { %p1893_p0 = scmp.ne.s32.totalorder (!%p368_p10), %s2345_s12, 0 }
  0x21   : > { %s2494_s28 = scalar_select %p433_p12, %s2349_s13, 1 }
  0x22   : > { %s441_s29 = scalar_select %p440_p13, %s2345_s12, 1 }
  0x23   : > { %s1884_s17 = sshll.u32 %s2494_s28, 3  ;;  %471 = sbr.rel (%p1893_p0) target bundleno = 352 (0x160), region = 60  ;;  %vm475_vm0 = vcmask (!%p1893_p0), 261120   ;;  %v1894_v11 = vld [vmem:[%s2764_s2] ss:$0 sm:$0xff] (!%p1893_p0) }
  0x24   : > { %s436_s15 = scalar_lea.vmem %s2801_s0, %s1884_s17  ;;  %s2175_s14 = smul.u32 192, %s441_s29  ;;  %v1895_v13 = vld [vmem:[%s2764_s2 + $0x1] ss:$0 sm:$0xff] (!%p1893_p0) }
  0x25   : > { %s2176_s25 = smul.u32 6, %s441_s29  ;;  %s1924_s26 = sshll.u32 %s441_s29, 5  ;;  %v474_v0 = vld [vmem:[%s436_s15] sm:$0xff] (!%p1893_p0) }
  0x26   : > { %s2508_s30 = scalar_lea.vmem %s2802_s3, %s2175_s14  ;;  %s2513_s21 = scalar_lea.vmem %s2767_s5, %s1924_s26  ;;  %v476_v1 = vsel (!%p1893_p0), %vm475_vm0, %v474_v0, 0.0 }
  0x27   : > { %s2518_s23 = scalar_lea.vmem %s2766_s4, %s2176_s25  ;;  %s2523_s17 = scalar_lea.vmem %s2768_s6, %s1924_s26  ;;  %477 = vadd.xlane.f32.xlu0 (!%p1893_p0), %v476_v1 }
  0x28   : > { %s1926_s24 = sshll.u32 %s441_s29, 6  ;;  %s1892_s0 = sshll.u32 %s441_s29, 3 }
  0x29   : > { %s2528_s22 = scalar_lea.vmem %s2769_s7, %s1926_s24  ;;  %s2533_s3 = scalar_lea.vmem %s2770_s8, %s1892_s0 }
  0xb4   : > { %v478_v2 = vpop.xlane.xlu0 %477 }
  0xb5   : > { %v480_v3 = vmul.f32 0.03125, %v478_v2 }
  0xb7   : > { %v481_v4 = vsub.f32 %v474_v0, %v480_v3 }
  0xb9   : > { %v482_v5 = vmul.f32 %v481_v4, %v481_v4 }
  0xbb   : > { %v483_v6 = vsel %vm475_vm0, %v482_v5, 0.0 }
  0xbc   : > { %484 = vadd.xlane.f32.xlu0 %v483_v6 }
 0x149   : > { %v485_v7 = vpop.xlane.xlu0 %484 }
 0x14a   : > { %v486_v8 = vmul.f32 0.03125, %v485_v7 }
 0x14c   : > { %v487_v9 = vadd.f32 1e-12, %v486_v8 }
 0x14e   : > { %2251 = vrsqrt.f32 %v487_v9 }
 0x158   : > { %v2252_v10 = vpop.eup %2251 }
 0x159   : > { %v489_v12 = vmul.f32 %v2252_v10, %v481_v4 }
 0x15b   : > { %v494_v14 = vmul.f32 %v1894_v11, %v489_v12 }
 0x15d   : > { %v499_v15 = vadd.f32 %v1895_v13, %v494_v14 }
 0x15f   : > { %500 = vst.msk [vmem:[#allocation2] sm:$0xff] %vm475_vm0, %v499_v15 }
 0x160 PF: > { %v503_v16 = vld [vmem:[%s2508_s30] sm:$0xff]  ;;  %v504_v17 = vld [vmem:[%s2508_s30 + $0x8] sm:$0xff]  ;;  %v2363_v19 = vmov 0.0|0.0   ;;  %v505_v22 = vld [vmem:[%s2508_s30 + $0x10] sm:$0xff]  ;;  %vm2364_vm1 = vmmov 0   ;;  %v2365_v25 = vmov 0.0   ;;  %s2803_s18 = scalar_lea.vmem %s2763_s1, %s2494_s28 }
 0x161   : > { %v507_v18 = vld [vmem:[%s2508_s30 + $0x20] sm:$0xff]  ;;  %2115 = vmatprep.subr.bf16.mxu0 %v2363_v19  ;;  %v2116_v20 = vpack.c.bf16 %v504_v17, %v503_v16  ;;  %2121 = vmatprep.subr.bf16.mxu1 %v2363_v19  ;;  %v508_v21 = vld [vmem:[%s2508_s30 + $0x28] sm:$0xff]  ;;  %v506_v23 = vld [vmem:[%s2508_s30 + $0x18] sm:$0xff]  ;;  %vm569_vm2 = vcmask 261120   ;;  %vm1002_vm3 = vcmask 130048   ;;  %vm1155_vm4 = vcmask 64512  }
 0x162   : > { %v2122_v24 = vpack.c.bf16 %v508_v21, %v507_v18  ;;  %1993 = vmatprep.mubr.msk.f32.mxu0 %vm2364_vm1, %v2365_v25  ;;  %v509_v26 = vld [vmem:[%s2508_s30 + $0x30] sm:$0xff]  ;;  %v510_v27 = vld [vmem:[%s2508_s30 + $0x38] sm:$0xff]  ;;  %2004 = vmatprep.mubr.msk.f32.mxu1 %vm2364_vm1, %v2365_v25  ;;  %v2119_v28 = vpack.c.bf16 %v506_v23, %v505_v22  ;;  %v511_v30 = vld [vmem:[%s2508_s30 + $0x40] sm:$0xff]  ;;  %vm1609_vm5 = vcmask 523264   ;;  %p1919_p1 = scmp.ne.s32.totalorder %s2345_s12, 1 }
 0x163   : > { %2117 = vmatpush3.bf16.msra.mxu0 %v2116_v20  ;;  %v2125_v29 = vpack.c.bf16 %v510_v27, %v509_v26  ;;  %v512_v31 = vld [vmem:[%s2508_s30 + $0x48] sm:$0xff]  ;;  %v515_v32 = vld [vmem:[%s2508_s30 + $0x60] sm:$0xff]  ;;  %v513_v37 = vld [vmem:[%s2508_s30 + $0x50] sm:$0xff] }
 0x164   : > { %2118 = vmatprep.subr.bf16.mxu0 %v2363_v19  ;;  %2123 = vmatpush3.bf16.msra.mxu1 %v2122_v24  ;;  %v516_v33 = vld [vmem:[%s2508_s30 + $0x68] sm:$0xff]  ;;  %v2128_v35 = vpack.c.bf16 %v512_v31, %v511_v30  ;;  %v514_v38 = vld [vmem:[%s2508_s30 + $0x58] sm:$0xff]  ;;  %v517_v39 = vld [vmem:[%s2508_s30 + $0x70] sm:$0xff] }
 0x165   : > { %2124 = vmatprep.subr.bf16.mxu1 %v2363_v19  ;;  %v2134_v36 = vpack.c.bf16 %v516_v33, %v515_v32  ;;  %v518_v40 = vld [vmem:[%s2508_s30 + $0x78] sm:$0xff]  ;;  %v2131_v41 = vpack.c.bf16 %v514_v38, %v513_v37  ;;  %v519_v43 = vld [vmem:[%s2508_s30 + $0x80] sm:$0xff]  ;;  %v520_v44 = vld [vmem:[%s2508_s30 + $0x88] sm:$0xff] }
 0x166   : > { %v2566_v34 = vld [vmem:[#allocation2] sm:$0xff]  ;;  %v2137_v42 = vpack.c.bf16 %v518_v40, %v517_v39  ;;  %v2140_v45 = vpack.c.bf16 %v520_v44, %v519_v43  ;;  %v521_v46 = vld [vmem:[%s2508_s30 + $0x90] sm:$0xff]  ;;  %v522_v47 = vld [vmem:[%s2508_s30 + $0x98] sm:$0xff] }
 0x167   : > { %2120 = vmatpush3.bf16.msra.mxu0 %v2119_v28  ;;  %v2143_v48 = vpack.c.bf16 %v522_v47, %v521_v46  ;;  %v1896_v53 = vld [vmem:[%s2518_s23] ss:$0 sm:$0xff]  ;;  %v1898_v54 = vld [vmem:[%s2518_s23 + $0x2] ss:$0 sm:$0xff]  ;;  %v1899_v57 = vld [vmem:[%s2518_s23 + $0x3] ss:$0 sm:$0xff] }
 0x168   : > { %2126 = vmatpush3.bf16.msra.mxu1 %v2125_v29  ;;  %2127 = vmatprep.subr.bf16.mxu0 %v2363_v19  ;;  %v1897_v58 = vld [vmem:[%s2518_s23 + $0x1] ss:$0 sm:$0xff]  ;;  %v1900_v3 = vld [vmem:[%s2518_s23 + $0x4] ss:$0 sm:$0xff]  ;;  %v524_v8 = vld [vmem:[%s2508_s30 + $0xa8] sm:$0xff] }
 0x169   : > { %2133 = vmatprep.subr.bf16.mxu1 %v2363_v19  ;;  %v523_v7 = vld [vmem:[%s2508_s30 + $0xa0] sm:$0xff]  ;;  %v525_v9 = vld [vmem:[%s2508_s30 + $0xb0] sm:$0xff]  ;;  %v526_v11 = vld [vmem:[%s2508_s30 + $0xb8] sm:$0xff] }
 0x16a   : > { %1994 = vmatmul.mubr.msk.f32.vlgmr.msra.gmra.mrb[0].mxu0 %vm569_vm2, %v2566_v34  ;;  %v2146_v10 = vpack.c.bf16 %v524_v8, %v523_v7  ;;  %v2149_v12 = vpack.c.bf16 %v526_v11, %v525_v9  ;;  %v1908_v13 = vld [vmem:[%s2803_s18] ss:$0 sm:$0xff]  ;;  %v1508_v11 = vld [vmem:[%s2523_s17 + $0x8] sm:$0xff] }
 0x16b   : > { %2129 = vmatpush3.bf16.msra.mxu0 %v2128_v35  ;;  %2005 = vmatmul.mubr.msk.f32.vlgmr.msra.gmra.mrb[0].mxu1 %vm569_vm2, %v2566_v34 }
 0x16c   : > { %2130 = vmatprep.subr.bf16.mxu0 %v2363_v19  ;;  %2135 = vmatpush3.bf16.msra.mxu1 %v2134_v36  ;;  %v1901_v36 = vld [vmem:[%s2518_s23 + $0x5] ss:$0 sm:$0xff] }
 0x16d   : > { %2015 = vmatprep.mubr.msk.f32.mxu0 %vm2364_vm1, %v2365_v25  ;;  %2136 = vmatprep.subr.bf16.mxu1 %v2363_v19 }
 0x16e   : > { %2026 = vmatprep.mubr.msk.f32.mxu1 %vm2364_vm1, %v2365_v25 }
 0x16f   : > { %2132 = vmatpush3.bf16.msra.mxu0 %v2131_v41  ;;  %v1324_v41 = vld [vmem:[%s2513_s21] sm:$0xff] }
 0x170   : > { %2138 = vmatpush3.bf16.msra.mxu1 %v2137_v42  ;;  %2139 = vmatprep.subr.bf16.mxu0 %v2363_v19  ;;  %v1325_v42 = vld [vmem:[%s2513_s21 + $0x8] sm:$0xff] }
 0x171   : > { %2145 = vmatprep.subr.bf16.mxu1 %v2363_v19  ;;  %v2152_v44 = vpack.c.bf16 %v1325_v42, %v1324_v41 }
 0x172   : > { %2016 = vmatmul.mubr.msk.f32.vlgmr.msra.gmra.mrb[2].mxu0 %vm569_vm2, %v2566_v34 }
 0x173   : > { %2027 = vmatmul.mubr.msk.f32.vlgmr.msra.gmra.mrb[2].mxu1 %vm569_vm2, %v2566_v34  ;;  %2141 = vmatpush3.bf16.msra.mxu0 %v2140_v45 }
 0x174   : > { %2142 = vmatprep.subr.bf16.mxu0 %v2363_v19  ;;  %2037 = vmatprep.mubr.msk.f32.mxu0 %vm2364_vm1, %v2365_v25 }
 0x175   : > { %2048 = vmatprep.mubr.msk.f32.mxu1 %vm2364_vm1, %v2365_v25  ;;  %2147 = vmatpush3.bf16.msra.mxu1 %v2146_v10  ;;  %v1507_v10 = vld [vmem:[%s2523_s17] sm:$0xff] }
 0x176   : > { %2148 = vmatprep.subr.bf16.mxu1 %v2363_v19 }
 0x177   : > { %2144 = vmatpush3.bf16.msra.mxu0 %v2143_v48  ;;  %v1326_v48 = vld [vmem:[%s2513_s21 + $0x10] sm:$0xff] }
 0x178   : > { %2051 = vmatprep.subr.mxu0 %v2365_v25 }
 0x179   : > { %2150 = vmatpush3.bf16.msra.mxu1 %v2149_v12  ;;  %v2158_v12 = vpack.c.bf16 %v1508_v11, %v1507_v10 }
 0x17a   : > { %2038 = vmatmul.mubr.msk.f32.vlgmr.msra.gmra.mrb[4].mxu0 %vm569_vm2, %v2566_v34  ;;  %2066 = vmatprep.subr.mxu1 %v2365_v25 }
 0x17b   : > { %2053 = vmatprep.mubr.msk.f32.mxu0 %vm2364_vm1, %v2365_v25 }
 0x17c   : > { %2049 = vmatmul.mubr.msk.f32.vlgmr.msra.gmra.mrb[4].mxu1 %vm569_vm2, %v2566_v34 }
 0x17d   : > { %2068 = vmatprep.mubr.msk.f32.mxu1 %vm2364_vm1, %v2365_v25 }
 0x23d   : > { %v639_v49 = vpop.f32.mrb[0].mxu0 }
 0x23e   : > { %v1995_v50 = vpop.f32.mrb[1].mxu0  ;;  %v709_v51 = vpop.f32.mrb[0].mxu1  ;;  %v640_v55 = vadd.f32 %v1896_v53, %v639_v49  ;;  %v1327_v49 = vld [vmem:[%s2513_s21 + $0x18] sm:$0xff] }
 0x23f   : > { %v2006_v52 = vpop.f32.mrb[1].mxu1  ;;  %v710_v1 = vadd.f32 %v1897_v58, %v709_v51  ;;  %v2155_v50 = vpack.c.bf16 %v1327_v49, %v1326_v48 }
 0x240   : > { %v993_v0 = vmul.f32 0.25, %v640_v55  ;;  %v1477_v55 = vlaneseq }
 0x241   : > { %v994_v2 = vmul.f32 0.25, %v710_v1 }
 0x245   : > { %v779_v56 = vpop.f32.mrb[2].mxu0 }
 0x246   : > { %v780_v59 = vadd.f32 %v1898_v54, %v779_v56  ;;  %v2017_v60 = vpop.f32.mrb[3].mxu0  ;;  %v849_v61 = vpop.f32.mrb[2].mxu1  ;;  %v2659_v56 = vshrl.u32 %v1477_v55, 7 }
 0x247   : > { %v2028_v62 = vpop.f32.mrb[3].mxu1  ;;  %v850_v63 = vadd.f32 %v1899_v57, %v849_v61  ;;  %v2663_v60 = vld [vmem:[%s2533_s3] sm:$0xff] }
 0x248   : > { %2052 = vmatpush3.xpose.msk.msra.mxu0 %vm1002_vm3, %v780_v59  ;;  %v1479_v58 = vsub.s32 0, %v2659_v56  ;;  %v1513_v41 = vsub.s32 3, %v2659_v56 }
 0x249   : > { %2056 = vmatprep.subr.mxu0 %v2365_v25 }
 0x24a   : > { %v1480_v62 = vrot.slane %v2663_v60, %v1479_v58  ;;  %v1514_v42 = vrot.slane %v2663_v60, %v1513_v41 }
 0x24b   : > { %2054 = vmatmul.mubr.msk.f32.vlgmr.msra.gmra.mrb[6].mxu0 %vm1002_vm3, %v993_v0 }
 0x24c   : > { %2057 = vmatpush3.xpose.msk.msra.mxu0 %vm1002_vm3, %v850_v63  ;;  %2058 = vmatprep.mubr.msk.f32.mxu0 %vm2364_vm1, %v2365_v25 }
 0x24d   : > { %2061 = vmatprep.subr.mxu0 %v2365_v25  ;;  %v919_v4 = vpop.f32.mrb[4].mxu0 }
 0x24e   : > { %v920_v5 = vadd.f32 %v1900_v3, %v919_v4  ;;  %v2039_v6 = vpop.f32.mrb[5].mxu0 }
 0x24f   : > { %2059 = vmatmul.mubr.msk.f32.vlgmr.msra.gmra.mrb[8].mxu0 %vm1002_vm3, %v994_v2  ;;  %v989_v35 = vpop.f32.mrb[4].mxu1 }
 0x250   : > { %2063 = vmatprep.mubr.msk.f32.mxu0 %vm2364_vm1, %v2365_v25  ;;  %2062 = vmatpush3.msra.mxu0 %v920_v5  ;;  %v2050_v37 = vpop.f32.mrb[5].mxu1  ;;  %v990_v38 = vadd.f32 %v1901_v36, %v989_v35  ;;  %v1601_v35 = vld [vmem:[%s2528_s22 + $0x20] sm:$0xff]  ;;  %v1602_v36 = vld [vmem:[%s2528_s22 + $0x28] sm:$0xff] }
 0x251   : > { %2151 = vmatprep.subr.bf16.mxu0 %v2363_v19  ;;  %v2170_v37 = vpack.c.bf16 %v1602_v36, %v1601_v35 }
 0x252   : > { %2067 = vmatpush3.msra.mxu1 %v990_v38  ;;  %v1603_v38 = vld [vmem:[%s2528_s22 + $0x30] sm:$0xff] }
 0x253   : > { %2154 = vmatprep.subr.bf16.mxu1 %v2363_v19 }
 0x31e   : > { %v1075_v14 = vpop.f32.mrb[6].mxu0 }
 0x31f   : > { %v1076_v15 = vadd.f32 %v1908_v13, %v1075_v14  ;;  %v2055_v16 = vpop.f32.mrb[7].mxu0  ;;  %v1510_v14 = vld [vmem:[%s2523_s17 + $0x18] sm:$0xff] }
 0x321   : > { %v1156_v17 = vsel %vm1155_vm4, %v1076_v15, -inf }
 0x322   : > { %1157 = vmax.xlane.f32.xlu0 %v1156_v17  ;;  %v1151_v18 = vpop.f32.mrb[8].mxu0 }
 0x323   : > { %v1152_v20 = vadd.f32 %v1908_v13, %v1151_v18  ;;  %v2060_v21 = vpop.f32.mrb[9].mxu0  ;;  %v1509_v13 = vld [vmem:[%s2523_s17 + $0x10] sm:$0xff]  ;;  %v1499_v18 = vsub.s32 1, %v2659_v56 }
 0x325   : > { %v1159_v22 = vsel %vm1155_vm4, %v1152_v20, -inf  ;;  %v1500_v21 = vrot.slane %v2663_v60, %v1499_v18 }
 0x326   : > { %1160 = vmax.xlane.f32.xlu0 %v1159_v22 }
 0x3af   : > { %v1158_v23 = vpop.xlane.xlu0 %1157 }
 0x3b0   : > { %v1162_v24 = vsub.f32 %v1076_v15, %v1158_v23 }
 0x3b2   : > { %v1164_v26 = vmul.f32 1.442695, %v1162_v24 }
 0x3b3   : > { %v1161_v27 = vpop.xlane.xlu0 %1160 }
 0x3b4   : > { %2253 = vpow2.f32 %v1164_v26  ;;  %v1163_v28 = vsub.f32 %v1152_v20, %v1161_v27  ;;  %v1504_v20 = vsub.s32 2, %v2659_v56 }
 0x3b6   : > { %v1166_v29 = vmul.f32 1.442695, %v1163_v28  ;;  %v1505_v24 = vrot.slane %v2663_v60, %v1504_v20  ;;  %v1597_v28 = vld [vmem:[%s2528_s22] sm:$0xff] }
 0x3b8   : > { %2255 = vpow2.f32 %v1166_v29  ;;  %v1598_v29 = vld [vmem:[%s2528_s22 + $0x8] sm:$0xff] }
 0x3be   : > { %v2254_v30 = vpop.eup %2253 }
 0x3bf   : > { %v1168_v31 = vsel %vm1155_vm4, %v2254_v30, 0.0 }
 0x3c0   : > { %1169 = vadd.xlane.f32.xlu1 %v1168_v31  ;;  %v1599_v31 = vld [vmem:[%s2528_s22 + $0x10] sm:$0xff] }
 0x3c2   : > { %v2256_v32 = vpop.eup %2255 }
 0x3c3   : > { %v1171_v33 = vsel %vm1155_vm4, %v2256_v32, 0.0 }
 0x3c4   : > { %1172 = vadd.xlane.f32.xlu1 %v1171_v33 }
 0x44d   : > { %v1170_v39 = vpop.xlane.xlu1 %1169 }
 0x44e   : > { %2257 = vrcp.f32 %v1170_v39  ;;  %v1604_v39 = vld [vmem:[%s2528_s22 + $0x38] sm:$0xff] }
 0x451   : > { %v1173_v40 = vpop.xlane.xlu1 %1172 }
 0x452   : > { %2259 = vrcp.f32 %v1173_v40  ;;  %v2173_v40 = vpack.c.bf16 %v1604_v39, %v1603_v38 }
 0x458   : > { %v2258_v43 = vpop.eup %2257 }
 0x459   : > { %v1176_v45 = vmul.f32 %v2258_v43, %v2254_v30  ;;  %v2164_v30 = vpack.c.bf16 %v1598_v29, %v1597_v28 }
 0x45b   : > { %2064 = vmatmul.mubr.msk.f32.vlgmr.msra.gmra.mrb[10].mxu0 %vm1155_vm4, %v1176_v45 }
 0x45c   : > { %v2260_v46 = vpop.eup %2259  ;;  %2153 = vmatpush3.bf16.msra.mxu0 %v2152_v44  ;;  %2075 = vmatprep.mubr.msk.f32.mxu0 %vm2364_vm1, %v2365_v25 }
 0x45d   : > { %v1177_v47 = vmul.f32 %v2260_v46, %v2256_v32  ;;  %2157 = vmatprep.subr.bf16.mxu0 %v2363_v19  ;;  %v1600_v32 = vld [vmem:[%s2528_s22 + $0x18] sm:$0xff] }
 0x45e   : > { %v2167_v33 = vpack.c.bf16 %v1600_v32, %v1599_v31 }
 0x45f   : > { %2069 = vmatmul.mubr.msk.f32.vlgmr.msra.gmra.mrb[6].mxu1 %vm1155_vm4, %v1177_v47 }
 0x460   : > { %2082 = vmatprep.mubr.msk.f32.mxu1 %vm2364_vm1, %v2365_v25  ;;  %2156 = vmatpush3.bf16.msra.mxu1 %v2155_v50 }
 0x461   : > { %2163 = vmatprep.subr.bf16.mxu1 %v2363_v19 }
 0x52e   : > { %v1247_v51 = vpop.f32.mrb[10].mxu0 }
 0x52f   : > { %v2065_v52 = vpop.f32.mrb[11].mxu0  ;;  %2076 = vmatmul.mubr.msk.f32.vlgmr.msra.gmra.mrb[12].mxu0 %vm1002_vm3, %v1247_v51 }
 0x530   : > { %2093 = vmatprep.mubr.msk.f32.mxu0 %vm2364_vm1, %v2365_v25  ;;  %2159 = vmatpush3.bf16.msra.mxu0 %v2158_v12 }
 0x531   : > { %2160 = vmatprep.subr.bf16.mxu0 %v2363_v19 }
 0x532   : > { %v1320_v53 = vpop.f32.mrb[6].mxu1 }
 0x533   : > { %v2070_v54 = vpop.f32.mrb[7].mxu1  ;;  %2083 = vmatmul.mubr.msk.f32.vlgmr.msra.gmra.mrb[8].mxu1 %vm1002_vm3, %v1320_v53 }
 0x534   : > { %2112 = vmatprep.mubr.msk.f32.mxu1 %vm2364_vm1, %v2365_v25  ;;  %2165 = vmatpush3.bf16.msra.mxu1 %v2164_v30  ;;  %v1607_v54 = vsub.s32 4, %v2659_v56 }
 0x535   : > { %2166 = vmatprep.subr.bf16.mxu1 %v2363_v19 }
 0x536   : > { %v1608_v55 = vrot.slane %v2663_v60, %v1607_v54 }
 0x538   : > { %2168 = vmatpush3.bf16.msra.mxu1 %v2167_v33 }
 0x539   : > { %2169 = vmatprep.subr.bf16.mxu1 %v2363_v19 }
 0x53c   : > { %2171 = vmatpush3.bf16.msra.mxu1 %v2170_v37 }
 0x53d   : > { %2172 = vmatprep.subr.bf16.mxu1 %v2363_v19 }
 0x540   : > { %2174 = vmatpush3.bf16.msra.mxu1 %v2173_v40 }
 0x602   : > { %v1397_v57 = vpop.f32.mrb[12].mxu0 }
 0x603   : > { %v2077_v59 = vpop.f32.mrb[13].mxu0  ;;  %v1474_v63 = vsel %vm569_vm2, %v1397_v57, 0.0 }
 0x606   : > { %v1470_v61 = vpop.f32.mrb[8].mxu1 }
 0x607   : > { %v1475_v0 = vsel %vm569_vm2, %v1470_v61, 0.0  ;;  %v2084_v1 = vpop.f32.mrb[9].mxu1 }
 0x608   : > { %v1476_v25 = vadd.f32 %v1475_v0, %v1474_v63 }
 0x60a   : > { %v1481_v2 = vadd.f32 %v1480_v62, %v1476_v25 }
 0x60c   : > { %v1482_v3 = vadd.f32 %v1481_v2, %v2566_v34  ;;  %v2161_v34 = vpack.c.bf16 %v1510_v14, %v1509_v13 }
 0x60e   : > { %v1483_v4 = vsel %vm569_vm2, %v1482_v3, 0.0  ;;  %2162 = vmatpush3.bf16.msra.mxu0 %v2161_v34 }
 0x60f   : > { %1484 = vadd.xlane.f32.xlu0 %v1483_v4 }
 0x69c   : > { %v1485_v5 = vpop.xlane.xlu0 %1484 }
 0x69d   : > { %v1487_v6 = vmul.f32 0.03125, %v1485_v5 }
 0x69f   : > { %v1488_v7 = vsub.f32 %v1482_v3, %v1487_v6  ;;  %v1699_v6 = vsub.s32 5, %v2659_v56 }
 0x6a1   : > { %v1489_v8 = vmul.f32 %v1488_v7, %v1488_v7 }
 0x6a3   : > { %v1490_v9 = vsel %vm569_vm2, %v1489_v8, 0.0  ;;  %v1700_v8 = vrot.slane %v2663_v60, %v1699_v6 }
 0x6a4   : > { %1491 = vadd.xlane.f32.xlu1 %v1490_v9 }
 0x731   : > { %v1492_v15 = vpop.xlane.xlu1 %1491 }
 0x732   : > { %v1493_v16 = vmul.f32 0.03125, %v1492_v15 }
 0x734   : > { %v1494_v17 = vadd.f32 1e-12, %v1493_v16 }
 0x736   : > { %2261 = vrsqrt.f32 %v1494_v17 }
 0x740   : > { %v2262_v22 = vpop.eup %2261 }
 0x741   : > { %v1496_v23 = vmul.f32 %v2262_v22, %v1488_v7  ;;  %v1704_v7 = vsub.s32 6, %v2659_v56 }
 0x743   : > { %v1501_v26 = vmul.f32 %v1500_v21, %v1496_v23  ;;  %v1705_v10 = vrot.slane %v2663_v60, %v1704_v7 }
 0x745   : > { %v1506_v27 = vadd.f32 %v1505_v24, %v1501_v26 }
 0x747   : > { %2094 = vmatmul.mubr.msk.f32.vlgmr.msra.gmra.mrb[14].mxu0 %vm569_vm2, %v1506_v27 }
 0x81a   : > { %v1584_v43 = vpop.f32.mrb[14].mxu0 }
 0x81b   : > { %v1585_v44 = vadd.f32 %v1584_v43, %v1514_v42  ;;  %v2095_v45 = vpop.f32.mrb[15].mxu0 }
 0x81d   : > { %v1588_v46 = vmul.f32 %v1585_v44, %v1585_v44 }
 0x81f   : > { %v1589_v47 = vmul.f32 %v1588_v46, %v1585_v44 }
 0x821   : > { %v1590_v48 = vmul.f32 0.044715, %v1589_v47 }
 0x823   : > { %v1591_v49 = vadd.f32 %v1590_v48, %v1585_v44 }
 0x825   : > { %v1592_v50 = vmul.f32 0.7978846, %v1591_v49 }
 0x827   : > { %2263 = vtanh.f32 %v1592_v50 }
 0x831   : > { %v2264_v51 = vpop.eup %2263 }
 0x832   : > { %v1594_v52 = vadd.f32 1.0, %v2264_v51 }
 0x834   : > { %v1595_v19 = vmul.f32 0.5, %v1594_v52 }
 0x836   : > { %v1596_v53 = vmul.f32 %v1595_v19, %v1585_v44 }
 0x838   : > { %2113 = vmatmul.mubr.msk.f32.vlgmr.msra.gmra.mrb[10].mxu1 %vm1609_vm5, %v1596_v53 }
 0x90b   : > { %v1679_v57 = vpop.f32.mrb[10].mxu1 }
 0x90c   : > { %v1680_v58 = vadd.f32 %v1679_v57, %v1608_v55  ;;  %v2114_v59 = vpop.f32.mrb[11].mxu1 }
 0x90e   : > { %v1683_v61 = vadd.f32 %v1680_v58, %v1506_v27 }
 0x910   : > { %v1684_v62 = vsel %vm569_vm2, %v1683_v61, 0.0 }
 0x911   : > { %1685 = vadd.xlane.f32.xlu0 %v1684_v62 }
 0x99e   : > { %v1686_v63 = vpop.xlane.xlu0 %1685 }
 0x99f   : > { %v1687_v0 = vmul.f32 0.03125, %v1686_v63 }
 0x9a1   : > { %v1688_v1 = vsub.f32 %v1683_v61, %v1687_v0 }
 0x9a3   : > { %v1689_v25 = vmul.f32 %v1688_v1, %v1688_v1 }
 0x9a5   : > { %v1690_v2 = vsel %vm569_vm2, %v1689_v25, 0.0 }
 0x9a6   : > { %1691 = vadd.xlane.f32.xlu1 %v1690_v2 }
 0xa33   : > { %v1692_v3 = vpop.xlane.xlu1 %1691 }
 0xa34   : > { %v1693_v4 = vmul.f32 0.03125, %v1692_v3 }
 0xa36   : > { %v1694_v5 = vadd.f32 1e-12, %v1693_v4 }
 0xa38   : > { %2265 = vrsqrt.f32 %v1694_v5 }
 0xa42   : > { %v2266_v9 = vpop.eup %2265 }
 0xa43   : > { %v1696_v11 = vmul.f32 %v2266_v9, %v1688_v1  ;;  %1711 = sbr.rel (%p1919_p1) target bundleno = 2634 (0xa4a), region = 64 }
 0xa45   : > { %v1701_v12 = vmul.f32 %v1700_v8, %v1696_v11 }
 0xa47   : > { %v1706_v13 = vadd.f32 %v1705_v10, %v1701_v12 }
 0xa49   : > { %1707 = vst.msk [vmem:[#allocation2] sm:$0xff] %vm569_vm2, %v1706_v13  ;;  %1712 = vst.msk [vmem:[%s432_s10] sm:$0xff] (!%p1919_p1), %vm569_vm2, %v1706_v13 }
 0xa4a PF: > { %s2804_s3 = sld [smem:[#allocation7_spill]]  ;;  %s1921_s21 = sshll.u32 %s2349_s13, 7 }
 0xa4b   : > { %s2806_s19 = sld [smem:[#allocation19_spill]]  ;;  %s1727_s17 = sshll.u32 %s432_s10, 4  ;;  %s1728_s17 = int_to_ptr.vmem [resolvable:$true] %s1727_s17 }
 0xa4c   : > { %s2267_s14 = scalar_lea.vmem %s1728_s17, 128  ;;  %s2366_s22 = smov [#allocation3]  }
 0xa4d   : > { %p2268_p2 = scmp.ne.s32.totalorder %s1728_s17, %s2267_s14  ;;  %s2271_s9 = sshll.u32 %s2366_s22, 4  ;;  %s2272_s9 = int_to_ptr.vmem [resolvable:$false] %s2271_s9 }
 0xa4e   : > { %s2273_s16 = scalar_lea.vmem %s2272_s9, 256  ;;  %p2274_p6 = scmp.lt.s32.totalorder %s1728_s17, %s2272_s9 }
 0xa4f   : > { %p2269_p4 = pnand %p2268_p2, %p2466_p3  ;;  %p2275_p7 = scmp.lt.s32.totalorder %s2273_s16, %s2267_s14 }
 0xa50   : > { %s2807_s12 = sand.u32 1, %s2804_s3  }
 0xa51   : > { %s2711_s20 = scalar_lea.hbm %s2806_s19, %s1921_s21  ;;  %s1714_s11 = scalar_lea.sflag [#allocation4], %s2807_s12 }
 0xa52   : > { %p2270_p5 = pneg %p2269_p4  ;;  %p2276_p8 = por %p2275_p7, %p2274_p6 }
 0xa54   : > { %p2277_p10 = pnand %p2276_p8, %p2270_p5 }
 0xa56   : > { %2280 = shalt.err (!%p2277_p10)
}
 0xa57   : > { %s2281_s13 = scalar_lea.hbm %s2711_s20, 128  ;;  %s2285_s0 = scalar_lea.hbm %s2806_s19, 256 }
 0xa58   : > { %p2282_p11 = scmp.ne.s32.totalorder %s2711_s20, %s2281_s13  ;;  %p2286_p0 = scmp.lt.u32.totalorder %s2711_s20, %s2806_s19 }
 0xa59   : > { %p2287_p1 = scmp.lt.u32.totalorder %s2285_s0, %s2281_s13  ;;  %p2289_p4 = scmp.lt.u32.totalorder %s2281_s13, %s2711_s20 }
 0xa5a   : > { %p2283_p12 = pnand %p2282_p11, %p2466_p3 }
 0xa5b   : > { %p2288_p2 = por %p2287_p1, %p2286_p0 }
 0xa5c   : > { %p2284_p13 = pneg %p2283_p12 }
 0xa5d   : > { %p2290_p5 = por %p2289_p4, %p2288_p2 }
 0xa5f   : > { %p2291_p6 = pnand %p2290_p5, %p2284_p13 }
 0xa61   : > { %2294 = shalt.err (!%p2291_p6)
}
 0xa62   : > { %2177 = dma.vmem_to_hbm [thread:$0]  (%p2466_p3), %s1728_s17, 128, %s2711_s20, %s1714_s11  }
 0xa63 PF: > { %s2808_s26 = sld [smem:[#allocation11_spill]]  ;;  %s2809_s29 = sld [smem:[#allocation6_spill]] }
 0xa69   : > { %p2183_p7 = scmp.ge.s32.totalorder %s2808_s26, 2  ;;  %s1739_s18 = sand.u32 1, %s2809_s29  }
 0xa6a   : > { %s1740_s3 = scalar_lea.sflag [#allocation4], %s1739_s18 }
 0xa6b   : > { %p2180_p8 = pnand %p2183_p7, %p2476_p9 }
 0xa6d   : > { %2328 = dma.done.wait (!%p2180_p8), %s1740_s3, 128  }
 0xa6e   : > { %2330 = vsyncadd (!%p2180_p8), %s1740_s3, 4294967168  ;;  %s22_s16 = sadd.s32 1, %s2808_s26   ;;  %s2811_s30 = sld [smem:[#allocation7_spill]] }
 0xa6f   : > { %p19_p10 = scmp.ge.s32.totalorder %s22_s16, 6   ;;  %s2812_s10 = sld [smem:[#allocation8_spill]] }
 0xa70   : > { %s2813_s11 = sld [smem:[#allocation16_spill]]  ;;  %s2814_s12 = sld [smem:[#allocation9_spill]] }
 0xa71   : > { %s2815_s13 = sld [smem:[#allocation10_spill]]  ;;  %s2816_s14 = sld [smem:[#allocation12_spill]] }
 0xa72   : > { %s2817_s15 = sld [smem:[#allocation14_spill]]  ;;  %21 = sbr.rel (!%p19_p10) target bundleno = 9 (0x9), region = 120 }
 0xa79   :  { %1745 = vsyncpa [#allocation4], 1 }
 0xa7a   :  { %1747 = vsyncpa [#allocation4 + $0x1], 1 }

</bundles_post_ra>
